<compile_context>
chip_gen: v7x
topology: tpu7x:2x2x1
jax: 0.10.0
libtpu: 0.0.40
codegen_flags: <defaults>
</compile_context>

<pallas_src>
import functools
import math

import jax
import jax.numpy as jnp
from jax.experimental import pallas as pl
from jax.experimental.pallas import tpu as pltpu


# ----------------------------- Pallas kernel --------------------------------

def _self_attention_kernel(*refs, n_head, compute_dtype, shared_qkv):
    """Fused QKV projection + per-head masked-softmax attention + output
    projection for one batch tile.

    refs (shared_qkv=False):
        k_ref, v_ref, q_ref : (bt, L, D)      token inputs
        mask_ref            : (bt, L, L)      nonzero = attend
        wqkv_ref            : (3, H, D, hd)   bf16, 1/sqrt(hd) folded into Wq
        bqkv_ref            : (3, H, 1, hd)   f32
        wp_ref              : (H, hd, D_pad)  bf16 (lane padded)
        bp_ref              : (1, D_pad)      f32
        out_ref             : (bt, L, D_pad)
    refs (shared_qkv=True): a single token input replaces k/v/q.
    """
    if shared_qkv:
        q_ref, mask_ref, wqkv_ref, bqkv_ref, wp_ref, bp_ref, out_ref = refs
    else:
        (k_ref, v_ref, q_ref, mask_ref,
         wqkv_ref, bqkv_ref, wp_ref, bp_ref, out_ref) = refs

    bt, L, D = q_ref.shape
    hd = wqkv_ref.shape[-1]
    rows = bt * L
    D_pad = out_ref.shape[-1]
    cdt = compute_dtype

    # Cast token inputs to the MXU compute dtype ONCE (not per head).
    xq = q_ref[...].reshape(rows, D).astype(cdt)
    if shared_qkv:
        xk = xv = xq
    else:
        xk = k_ref[...].reshape(rows, D).astype(cdt)
        xv = v_ref[...].reshape(rows, D).astype(cdt)

    is_masked = mask_ref[...] == 0                       # (bt, L, L) bool
    neg = jnp.float32(-1e30)                             # ≡ -inf after softmax

    def project(x, w, b):
        # (rows, D) @ (D, hd) bf16 operands, f32 accumulation, f32 bias, -> bf16.
        return (jnp.dot(x, w, preferred_element_type=jnp.float32) + b).astype(cdt)

    acc = jnp.zeros((rows, D_pad), jnp.float32)
    for h in range(n_head):                              # static unroll over heads
        qh = project(xq, wqkv_ref[0, h], bqkv_ref[0, h]).reshape(bt, L, hd)
        kh = project(xk, wqkv_ref[1, h], bqkv_ref[1, h]).reshape(bt, L, hd)
        vh = project(xv, wqkv_ref[2, h], bqkv_ref[2, h]).reshape(bt, L, hd)

        # 1/sqrt(hd) is already folded into Wq/bq at pack time.
        att = jnp.einsum('bld,bmd->blm', qh, kh,
                         preferred_element_type=jnp.float32)       # (bt, L, L) f32
        att = jnp.where(is_masked, neg, att)
        att = att - jnp.max(att, axis=-1, keepdims=True)
        p = jnp.exp(att)                                           # EUP
        p = p * pl.reciprocal(jnp.sum(p, axis=-1, keepdims=True), approx=True)

        yh = jnp.einsum('blm,bmd->bld', p.astype(cdt), vh,
                        preferred_element_type=jnp.float32)        # (bt, L, hd) f32
        # Merge-heads + output projection as per-head accumulated matmuls.
        acc = acc + jnp.dot(yh.reshape(rows, hd).astype(cdt), wp_ref[h],
                            preferred_element_type=jnp.float32)

    out = acc + bp_ref[...]
    out_ref[...] = out.reshape(bt, L, D_pad).astype(out_ref.dtype)


# --------------------------- Tiling / HW helpers -----------------------------

def _largest_divisor_at_most(n, m):
    m = max(1, min(n, m))
    while n % m:
        m -= 1
    return m


def _num_tensorcores(default=1):
    """TensorCores per chip (2 on v7x, 1 on v5e/v6e). Best-effort query."""
    try:
        info = pltpu.get_tpu_info()
    except Exception:
        return default
    for attr in ("num_cores", "num_tensorcores", "tensorcore_count", "core_count"):
        val = getattr(info, attr, None)
        if val is None:
            continue
        try:
            val = int(val)
        except (TypeError, ValueError):
            continue
        if val > 0:
            return val
    return default


def _auto_batch_tile(B, L, num_cores=1, target_rows=256, min_rows=128):
    """Batch tile so each grid step feeds ~target_rows rows to the MXU.

    Only split the grid further for multi-TC chips (v7x), and only when every
    step still has >= min_rows rows; otherwise a longer grid is pure per-step
    pipeline overhead (fixes the old 'force grid >= 2' behaviour)."""
    bt = _largest_divisor_at_most(B, max(1, target_rows // max(L, 1)))
    if num_cores > 1 and (B // bt) < num_cores:
        cand = _largest_divisor_at_most(B, max(1, B // num_cores))
        if cand * L >= min_rows:
            bt = cand
    return bt


# ----------------------- One-time parameter packing --------------------------

def pack_params(params, n_head, compute_dtype=jnp.bfloat16):
    """One-time packing of the 8 Linear parameters into 4 kernel slabs.
    Call once at init; hoisted out of the forward hot path.

      w_qkv : (3, H, D, hd)   bf16, per-head split, 1/sqrt(hd) folded into Wq
      b_qkv : (3, H, 1, hd)   f32,  (same folding for bq)
      w_proj: (H, hd, D_pad)  bf16, per-head rows of Wp, zero-padded to 128 lanes
      b_proj: (1, D_pad)      f32

    Weights are stored pre-transposed as (in, out), i.e. y = x @ W + b.
    """
    D = params["wq"].shape[0]
    assert D % n_head == 0
    hd = D // n_head
    D_pad = ((D + 127) // 128) * 128
    scale = 1.0 / math.sqrt(hd)

    def split_heads_w(w):                           # (D, D) -> (H, D, hd)
        return jnp.stack([w[:, h * hd:(h + 1) * hd] for h in range(n_head)])

    def split_heads_b(b):                           # (D,)   -> (H, 1, hd)
        return jnp.stack([b[h * hd:(h + 1) * hd].reshape(1, hd)
                          for h in range(n_head)])

    w_qkv = jnp.stack([split_heads_w(params["wq"]) * scale,
                       split_heads_w(params["wk"]),
                       split_heads_w(params["wv"])]).astype(compute_dtype)
    b_qkv = jnp.stack([split_heads_b(params["bq"]) * scale,
                       split_heads_b(params["bk"]),
                       split_heads_b(params["bv"])]).astype(jnp.float32)

    wp_split = jnp.stack([params["wp"][h * hd:(h + 1) * hd, :]
                          for h in range(n_head)])              # (H, hd, D)
    w_proj = (jnp.zeros((n_head, hd, D_pad), jnp.float32)
              .at[:, :, :D].set(wp_split)).astype(compute_dtype)
    b_proj = (jnp.zeros((1, D_pad), jnp.float32)
              .at[:, :D].set(params["bp"].reshape(1, D)))

    return {"w_qkv": w_qkv, "b_qkv": b_qkv, "w_proj": w_proj, "b_proj": b_proj,
            "n_head": n_head, "n_embd": D, "head_dim": hd, "d_pad": D_pad,
            "compute_dtype": compute_dtype}


# ------------------------------ Host wrapper ---------------------------------

def self_attention_forward(key_in, value_in, query_in, atten_masks, packed, *,
                           batch_tile=None, num_cores=None, out_dtype=None,
                           return_padded=False):
    """key/value/query: (B, L, D); atten_masks: (B, L, L) (nonzero = attend).
    `packed` is the result of pack_params().  Returns (B, L, D) in out_dtype
    (default: query dtype), or the lane-padded (B, L, D_pad) slab when
    return_padded=True."""
    B, L, D = query_in.shape
    n_head = packed["n_head"]
    hd = packed["head_dim"]
    D_pad = packed["d_pad"]
    cdt = packed["compute_dtype"]
    assert D == packed["n_embd"]
    assert atten_masks.shape == (B, L, L)
    out_dtype = query_in.dtype if out_dtype is None else out_dtype

    if num_cores is None:
        num_cores = _num_tensorcores()
    if batch_tile is None:
        batch_tile = _auto_batch_tile(B, L, num_cores=num_cores)
    assert B % batch_tile == 0

    # Fast path: encoder self-attention (key is value is query) -> one token
    # block DMA per grid step instead of three.
    shared_qkv = (key_in is query_in) and (value_in is query_in)

    kernel = functools.partial(_self_attention_kernel, n_head=n_head,
                               compute_dtype=cdt, shared_qkv=shared_qkv)

    tok_spec = pl.BlockSpec((batch_tile, L, D), lambda i: (i, 0, 0))
    mask_spec = pl.BlockSpec((batch_tile, L, L), lambda i: (i, 0, 0))
    # Grid-invariant parameter slabs (DMA'd once, reused across grid steps).
    wqkv_spec = pl.BlockSpec((3, n_head, D, hd), lambda i: (0, 0, 0, 0))
    bqkv_spec = pl.BlockSpec((3, n_head, 1, hd), lambda i: (0, 0, 0, 0))
    wp_spec = pl.BlockSpec((n_head, hd, D_pad), lambda i: (0, 0, 0))
    bp_spec = pl.BlockSpec((1, D_pad), lambda i: (0, 0))
    out_spec = pl.BlockSpec((batch_tile, L, D_pad), lambda i: (i, 0, 0))

    tok_specs = [tok_spec] if shared_qkv else [tok_spec, tok_spec, tok_spec]
    tok_inputs = (query_in,) if shared_qkv else (key_in, value_in, query_in)
    in_specs = tok_specs + [mask_spec, wqkv_spec, bqkv_spec, wp_spec, bp_spec]

    # --- VMEM guard (matters only at transformer-scale D, esp. v7x 64 MiB) ---
    def nbytes(shape, dt):
        n = 1
        for s in shape:
            n *= s
        return n * jnp.dtype(dt).itemsize

    block_bytes = (len(tok_inputs) * nbytes((batch_tile, L, D), query_in.dtype)
                   + nbytes((batch_tile, L, L), atten_masks.dtype)
                   + nbytes((3, n_head, D, hd), cdt)
                   + nbytes((3, n_head, 1, hd), jnp.float32)
                   + nbytes((n_head, hd, D_pad), cdt)
                   + nbytes((1, D_pad), jnp.float32)
                   + nbytes((batch_tile, L, D_pad), out_dtype))
    vmem_est = 2 * block_bytes                       # double-buffered pipeline
    cp_kwargs = dict(dimension_semantics=("parallel",))
    if vmem_est > (24 << 20):
        # TODO(synk): for transformer-scale D also tile the K/N dims of the
        # projections instead of holding whole (D, hd)/(hd, D_pad) weight slabs.
        cp_kwargs["vmem_limit_bytes"] = int(min(vmem_est * 5 // 4, 100 << 20))
    compiler_params = pltpu.CompilerParams(**cp_kwargs)

    out_padded = pl.pallas_call(
        kernel,
        out_shape=jax.ShapeDtypeStruct((B, L, D_pad), out_dtype),
        grid_spec=pltpu.PrefetchScalarGridSpec(
            num_scalar_prefetch=0,
            grid=(B // batch_tile,),
            in_specs=in_specs,
            out_specs=out_spec,
        ),
        compiler_params=compiler_params,
    )(*tok_inputs, atten_masks, packed["w_qkv"], packed["b_qkv"],
      packed["w_proj"], packed["b_proj"])

    if return_padded or D_pad == D:
        return out_padded
    return out_padded[..., :D]


# --------------------------- Deterministic params ----------------------------

def make_params(key, n_embd):
    """Mimic SelfAttention.__init__: init_(nn.Linear) -> orthogonal weights with
    gain 0.01, zero biases.  Weights stored pre-transposed as (in, out)."""
    gain = 0.01
    kq, kk, kv, kp = jax.random.split(key, 4)
    ortho = jax.nn.initializers.orthogonal
    zeros = jnp.zeros((n_embd,), jnp.float32)
    return {
        "wq": ortho(scale=gain)(kq, (n_embd, n_embd), jnp.float32), "bq": zeros,
        "wk": ortho(scale=gain)(kk, (n_embd, n_embd), jnp.float32), "bk": zeros,
        "wv": ortho(scale=gain)(kv, (n_embd, n_embd), jnp.float32), "bv": zeros,
        "wp": ortho(scale=gain)(kp, (n_embd, n_embd), jnp.float32), "bp": zeros,
    }


def reference_forward(key_in, value_in, query_in, atten_masks, params, n_head):
    """Pure-JAX f32 reference matching the PyTorch forward (start_pos < 0)."""
    B, L, D = query_in.shape
    hd = D // n_head

    def lin(x, w, b):
        return x @ w + b

    def heads(x):
        return x.reshape(B, L, n_head, hd).transpose(0, 2, 1, 3)   # (B,H,L,hd)

    q = heads(lin(query_in, params["wq"], params["bq"]))
    k = heads(lin(key_in, params["wk"], params["bk"]))
    v = heads(lin(value_in, params["wv"], params["bv"]))

    att = (q @ jnp.swapaxes(k, -2, -1)) * (1.0 / math.sqrt(hd))     # (B,H,L,L)
    att = jnp.where(atten_masks[:, None, :, :] == 0, -jnp.inf, att)
    att = jax.nn.softmax(att, axis=-1)
    y = att @ v                                                     # (B,H,L,hd)
    y = jnp.swapaxes(y, 1, 2).reshape(B, L, D)
    return y @ params["wp"] + params["bp"]


# ----------------------------------- main ------------------------------------

if __name__ == "__main__":
    # Shapes consistent with the module:
    #   SelfAttention(n_embd=32, n_head=2, n_agent=8); batch=2, L=n_agent=8
    batch, n_agent = 2, 8
    n_embd, n_head = 32, 2
    L = n_agent

    root = jax.random.PRNGKey(0)
    kp, kq, kk, kv = jax.random.split(root, 4)
    params = make_params(kp, n_embd)
    packed = pack_params(params, n_head=n_head)      # hoisted one-time packing

    query = jax.random.normal(kq, (batch, L, n_embd), dtype=jnp.float32)
    key_x = jax.random.normal(kk, (batch, L, n_embd), dtype=jnp.float32)
    value = jax.random.normal(kv, (batch, L, n_embd), dtype=jnp.float32)
    # Lower-triangular attend mask (nonzero = attend), like the module buffer.
    atten_masks = jnp.broadcast_to(jnp.tril(jnp.ones((L, L), jnp.float32)),
                                   (batch, L, L))

    # General path (distinct key / value / query tensors).
    out = self_attention_forward(key_x, value, query, atten_masks, packed)
    out = jax.block_until_ready(out)
    ref = reference_forward(key_x, value, query, atten_masks, params, n_head)
    assert out.shape == (batch, L, n_embd)
    assert not bool(jnp.any(jnp.isnan(out)))
    assert jnp.allclose(out, ref, atol=2e-5, rtol=2e-2), (
        f"general path mismatch: max abs err {float(jnp.max(jnp.abs(out - ref)))}")

    # Shared-input fast path (encoder self-attention: key is value is query).
    out_s = self_attention_forward(query, query, query, atten_masks, packed)
    out_s = jax.block_until_ready(out_s)
    ref_s = reference_forward(query, query, query, atten_masks, params, n_head)
    assert not bool(jnp.any(jnp.isnan(out_s)))
    assert jnp.allclose(out_s, ref_s, atol=2e-5, rtol=2e-2), (
        f"shared path mismatch: max abs err {float(jnp.max(jnp.abs(out_s - ref_s)))}")

    print("KERNEL_OK")
</pallas_src>

<mosaic_0001>
module attributes {stable_mosaic.version = 11 : i64} {
  func.func @_self_attention_kernel(%arg0: i32, %arg1: memref<2x8x32xf32, #tpu.memory_space<vmem>>, %arg2: memref<2x8x32xf32, #tpu.memory_space<vmem>>, %arg3: memref<2x8x32xf32, #tpu.memory_space<vmem>>, %arg4: memref<2x8x8xf32, #tpu.memory_space<vmem>>, %arg5: memref<3x2x32x16xbf16, #tpu.memory_space<vmem>>, %arg6: memref<3x2x1x16xf32, #tpu.memory_space<vmem>>, %arg7: memref<2x16x128xbf16, #tpu.memory_space<vmem>>, %arg8: memref<1x128xf32, #tpu.memory_space<vmem>>, %arg9: memref<2x8x128xf32, #tpu.memory_space<vmem>>) attributes {dimension_semantics = [#tpu.dimension_semantics<parallel>], iteration_bounds = array<i64: 1>, scalar_prefetch = 0 : i64, scratch_operands = 0 : i64, tpu.core_type = #tpu.core_type<tc>, window_params = [{transform_indices = @transform_0, window_bounds = array<i64: 2, 8, 32>}, {transform_indices = @transform_1, window_bounds = array<i64: 2, 8, 32>}, {transform_indices = @transform_2, window_bounds = array<i64: 2, 8, 32>}, {transform_indices = @transform_3, window_bounds = array<i64: 2, 8, 8>}, {pipeline_mode = #tpu.pipeline_mode<synchronous>, transform_indices = @transform_4, window_bounds = array<i64: 3, 2, 32, 16>}, {pipeline_mode = #tpu.pipeline_mode<synchronous>, transform_indices = @transform_5, window_bounds = array<i64: 3, 2, 1, 16>}, {pipeline_mode = #tpu.pipeline_mode<synchronous>, transform_indices = @transform_6, window_bounds = array<i64: 2, 16, 128>}, {pipeline_mode = #tpu.pipeline_mode<synchronous>, transform_indices = @transform_7, window_bounds = array<i64: 1, 128>}, {transform_indices = @transform_8, window_bounds = array<i64: 2, 8, 128>}]} {
    %c0 = arith.constant 0 : index
    %c0_0 = arith.constant 0 : index
    %c0_1 = arith.constant 0 : index
    %0 = vector.load %arg3[%c0, %c0_0, %c0_1] : memref<2x8x32xf32, #tpu.memory_space<vmem>>, vector<2x8x32xf32>
    %1 = vector.shape_cast %0 : vector<2x8x32xf32> to vector<16x32xf32>
    %2 = arith.truncf %1 : vector<16x32xf32> to vector<16x32xbf16>
    %c0_2 = arith.constant 0 : index
    %c0_3 = arith.constant 0 : index
    %c0_4 = arith.constant 0 : index
    %3 = vector.load %arg1[%c0_2, %c0_3, %c0_4] : memref<2x8x32xf32, #tpu.memory_space<vmem>>, vector<2x8x32xf32>
    %4 = vector.shape_cast %3 : vector<2x8x32xf32> to vector<16x32xf32>
    %5 = arith.truncf %4 : vector<16x32xf32> to vector<16x32xbf16>
    %c0_5 = arith.constant 0 : index
    %c0_6 = arith.constant 0 : index
    %c0_7 = arith.constant 0 : index
    %6 = vector.load %arg2[%c0_5, %c0_6, %c0_7] : memref<2x8x32xf32, #tpu.memory_space<vmem>>, vector<2x8x32xf32>
    %7 = vector.shape_cast %6 : vector<2x8x32xf32> to vector<16x32xf32>
    %8 = arith.truncf %7 : vector<16x32xf32> to vector<16x32xbf16>
    %c0_8 = arith.constant 0 : index
    %c0_9 = arith.constant 0 : index
    %c0_10 = arith.constant 0 : index
    %9 = vector.load %arg4[%c0_8, %c0_9, %c0_10] : memref<2x8x8xf32, #tpu.memory_space<vmem>>, vector<2x8x8xf32>
    %cst = arith.constant 0.000000e+00 : f32
    %10 = vector.broadcast %cst : f32 to vector<2x8x8xf32>
    %11 = arith.cmpf oeq, %9, %10 : vector<2x8x8xf32>
    %cst_11 = arith.constant 0.000000e+00 : f32
    %12 = vector.broadcast %cst_11 : f32 to vector<16x128xf32>
    %c0_12 = arith.constant 0 : index
    %c0_13 = arith.constant 0 : index
    %c0_14 = arith.constant 0 : index
    %c0_15 = arith.constant 0 : index
    %13 = vector.load %arg5[%c0_12, %c0_13, %c0_14, %c0_15] : memref<3x2x32x16xbf16, #tpu.memory_space<vmem>>, vector<1x1x32x16xbf16>
    %14 = vector.shape_cast %13 : vector<1x1x32x16xbf16> to vector<32x16xbf16>
    %c0_16 = arith.constant 0 : index
    %c0_17 = arith.constant 0 : index
    %c0_18 = arith.constant 0 : index
    %c0_19 = arith.constant 0 : index
    %15 = vector.load %arg6[%c0_16, %c0_17, %c0_18, %c0_19] : memref<3x2x1x16xf32, #tpu.memory_space<vmem>>, vector<1x1x1x16xf32>
    %16 = vector.shape_cast %15 : vector<1x1x1x16xf32> to vector<1x16xf32>
    %cst_20 = arith.constant dense<0.000000e+00> : vector<16x16xf32>
    %17 = tpu.matmul %2, %14, %cst_20 {dimension_numbers = #tpu.dot_dimension_numbers<[1], [0], [0], [1], [0, 0, 1, 1], [], []>} : vector<16x32xbf16>, vector<32x16xbf16>, vector<16x16xf32> -> vector<16x16xf32>
    %18 = vector.broadcast %16 : vector<1x16xf32> to vector<16x16xf32>
    %19 = arith.addf %17, %18 : vector<16x16xf32>
    %20 = arith.truncf %19 : vector<16x16xf32> to vector<16x16xbf16>
    %21 = vector.shape_cast %20 : vector<16x16xbf16> to vector<2x8x16xbf16>
    %c1 = arith.constant 1 : index
    %c0_21 = arith.constant 0 : index
    %c0_22 = arith.constant 0 : index
    %c0_23 = arith.constant 0 : index
    %22 = vector.load %arg5[%c1, %c0_21, %c0_22, %c0_23] : memref<3x2x32x16xbf16, #tpu.memory_space<vmem>>, vector<1x1x32x16xbf16>
    %23 = vector.shape_cast %22 : vector<1x1x32x16xbf16> to vector<32x16xbf16>
    %c1_24 = arith.constant 1 : index
    %c0_25 = arith.constant 0 : index
    %c0_26 = arith.constant 0 : index
    %c0_27 = arith.constant 0 : index
    %24 = vector.load %arg6[%c1_24, %c0_25, %c0_26, %c0_27] : memref<3x2x1x16xf32, #tpu.memory_space<vmem>>, vector<1x1x1x16xf32>
    %25 = vector.shape_cast %24 : vector<1x1x1x16xf32> to vector<1x16xf32>
    %cst_28 = arith.constant dense<0.000000e+00> : vector<16x16xf32>
    %26 = tpu.matmul %5, %23, %cst_28 {dimension_numbers = #tpu.dot_dimension_numbers<[1], [0], [0], [1], [0, 0, 1, 1], [], []>} : vector<16x32xbf16>, vector<32x16xbf16>, vector<16x16xf32> -> vector<16x16xf32>
    %27 = vector.broadcast %25 : vector<1x16xf32> to vector<16x16xf32>
    %28 = arith.addf %26, %27 : vector<16x16xf32>
    %29 = arith.truncf %28 : vector<16x16xf32> to vector<16x16xbf16>
    %30 = vector.shape_cast %29 : vector<16x16xbf16> to vector<2x8x16xbf16>
    %c2 = arith.constant 2 : index
    %c0_29 = arith.constant 0 : index
    %c0_30 = arith.constant 0 : index
    %c0_31 = arith.constant 0 : index
    %31 = vector.load %arg5[%c2, %c0_29, %c0_30, %c0_31] : memref<3x2x32x16xbf16, #tpu.memory_space<vmem>>, vector<1x1x32x16xbf16>
    %32 = vector.shape_cast %31 : vector<1x1x32x16xbf16> to vector<32x16xbf16>
    %c2_32 = arith.constant 2 : index
    %c0_33 = arith.constant 0 : index
    %c0_34 = arith.constant 0 : index
    %c0_35 = arith.constant 0 : index
    %33 = vector.load %arg6[%c2_32, %c0_33, %c0_34, %c0_35] : memref<3x2x1x16xf32, #tpu.memory_space<vmem>>, vector<1x1x1x16xf32>
    %34 = vector.shape_cast %33 : vector<1x1x1x16xf32> to vector<1x16xf32>
    %cst_36 = arith.constant dense<0.000000e+00> : vector<16x16xf32>
    %35 = tpu.matmul %8, %32, %cst_36 {dimension_numbers = #tpu.dot_dimension_numbers<[1], [0], [0], [1], [0, 0, 1, 1], [], []>} : vector<16x32xbf16>, vector<32x16xbf16>, vector<16x16xf32> -> vector<16x16xf32>
    %36 = vector.broadcast %34 : vector<1x16xf32> to vector<16x16xf32>
    %37 = arith.addf %35, %36 : vector<16x16xf32>
    %38 = arith.truncf %37 : vector<16x16xf32> to vector<16x16xbf16>
    %39 = vector.shape_cast %38 : vector<16x16xbf16> to vector<2x8x16xbf16>
    "tpu.trace_start"() <{level = 10 : i32, message = "bld,bmd->blm"}> : () -> ()
    %cst_37 = arith.constant dense<0.000000e+00> : vector<2x8x8xf32>
    %40 = tpu.matmul %21, %30, %cst_37 {dimension_numbers = #tpu.dot_dimension_numbers<[2], [2], [1], [1], [0, 0, 0, 1, 1, 1], [0], [0]>} : vector<2x8x16xbf16>, vector<2x8x16xbf16>, vector<2x8x8xf32> -> vector<2x8x8xf32>
    %cst_38 = arith.constant -1.000000e+30 : f32
    "tpu.trace_stop"() : () -> ()
    %41 = vector.broadcast %cst_38 : f32 to vector<2x8x8xf32>
    %42 = arith.select %11, %41, %40 : vector<2x8x8xi1>, vector<2x8x8xf32>
    %cst_39 = arith.constant dense<0xFF800000> : vector<2x8xf32>
    %43 = vector.multi_reduction <maximumf>, %42, %cst_39 [2] : vector<2x8x8xf32> to vector<2x8xf32>
    %44 = vector.shape_cast %43 : vector<2x8xf32> to vector<2x8x1xf32>
    %45 = vector.broadcast %44 : vector<2x8x1xf32> to vector<2x8x8xf32>
    %46 = arith.subf %42, %45 : vector<2x8x8xf32>
    %47 = math.exp %46 : vector<2x8x8xf32>
    %cst_40 = arith.constant dense<0.000000e+00> : vector<2x8xf32>
    %48 = vector.multi_reduction <add>, %47, %cst_40 [2] : vector<2x8x8xf32> to vector<2x8xf32>
    %49 = vector.shape_cast %48 : vector<2x8xf32> to vector<2x8x1xf32>
    %50 = tpu.reciprocal %49 {approx = true} : vector<2x8x1xf32> -> vector<2x8x1xf32>
    %51 = vector.broadcast %50 : vector<2x8x1xf32> to vector<2x8x8xf32>
    %52 = arith.mulf %47, %51 : vector<2x8x8xf32>
    %53 = arith.truncf %52 : vector<2x8x8xf32> to vector<2x8x8xbf16>
    "tpu.trace_start"() <{level = 10 : i32, message = "blm,bmd->bld"}> : () -> ()
    %cst_41 = arith.constant dense<0.000000e+00> : vector<2x8x16xf32>
    %54 = tpu.matmul %53, %39, %cst_41 {dimension_numbers = #tpu.dot_dimension_numbers<[2], [1], [1], [2], [0, 0, 0, 1, 1, 2], [0], [0]>} : vector<2x8x8xbf16>, vector<2x8x16xbf16>, vector<2x8x16xf32> -> vector<2x8x16xf32>
    "tpu.trace_stop"() : () -> ()
    %55 = vector.shape_cast %54 : vector<2x8x16xf32> to vector<16x16xf32>
    %56 = arith.truncf %55 : vector<16x16xf32> to vector<16x16xbf16>
    %c0_42 = arith.constant 0 : index
    %c0_43 = arith.constant 0 : index
    %c0_44 = arith.constant 0 : index
    %57 = vector.load %arg7[%c0_42, %c0_43, %c0_44] : memref<2x16x128xbf16, #tpu.memory_space<vmem>>, vector<1x16x128xbf16>
    %58 = vector.shape_cast %57 : vector<1x16x128xbf16> to vector<16x128xbf16>
    %cst_45 = arith.constant dense<0.000000e+00> : vector<16x128xf32>
    %59 = tpu.matmul %56, %58, %cst_45 {dimension_numbers = #tpu.dot_dimension_numbers<[1], [0], [0], [1], [0, 0, 1, 1], [], []>} : vector<16x16xbf16>, vector<16x128xbf16>, vector<16x128xf32> -> vector<16x128xf32>
    %60 = arith.addf %12, %59 : vector<16x128xf32>
    %c0_46 = arith.constant 0 : index
    %c1_47 = arith.constant 1 : index
    %c0_48 = arith.constant 0 : index
    %c0_49 = arith.constant 0 : index
    %61 = vector.load %arg5[%c0_46, %c1_47, %c0_48, %c0_49] : memref<3x2x32x16xbf16, #tpu.memory_space<vmem>>, vector<1x1x32x16xbf16>
    %62 = vector.shape_cast %61 : vector<1x1x32x16xbf16> to vector<32x16xbf16>
    %c0_50 = arith.constant 0 : index
    %c1_51 = arith.constant 1 : index
    %c0_52 = arith.constant 0 : index
    %c0_53 = arith.constant 0 : index
    %63 = vector.load %arg6[%c0_50, %c1_51, %c0_52, %c0_53] : memref<3x2x1x16xf32, #tpu.memory_space<vmem>>, vector<1x1x1x16xf32>
    %64 = vector.shape_cast %63 : vector<1x1x1x16xf32> to vector<1x16xf32>
    %cst_54 = arith.constant dense<0.000000e+00> : vector<16x16xf32>
    %65 = tpu.matmul %2, %62, %cst_54 {dimension_numbers = #tpu.dot_dimension_numbers<[1], [0], [0], [1], [0, 0, 1, 1], [], []>} : vector<16x32xbf16>, vector<32x16xbf16>, vector<16x16xf32> -> vector<16x16xf32>
    %66 = vector.broadcast %64 : vector<1x16xf32> to vector<16x16xf32>
    %67 = arith.addf %65, %66 : vector<16x16xf32>
    %68 = arith.truncf %67 : vector<16x16xf32> to vector<16x16xbf16>
    %69 = vector.shape_cast %68 : vector<16x16xbf16> to vector<2x8x16xbf16>
    %c1_55 = arith.constant 1 : index
    %c1_56 = arith.constant 1 : index
    %c0_57 = arith.constant 0 : index
    %c0_58 = arith.constant 0 : index
    %70 = vector.load %arg5[%c1_55, %c1_56, %c0_57, %c0_58] : memref<3x2x32x16xbf16, #tpu.memory_space<vmem>>, vector<1x1x32x16xbf16>
    %71 = vector.shape_cast %70 : vector<1x1x32x16xbf16> to vector<32x16xbf16>
    %c1_59 = arith.constant 1 : index
    %c1_60 = arith.constant 1 : index
    %c0_61 = arith.constant 0 : index
    %c0_62 = arith.constant 0 : index
    %72 = vector.load %arg6[%c1_59, %c1_60, %c0_61, %c0_62] : memref<3x2x1x16xf32, #tpu.memory_space<vmem>>, vector<1x1x1x16xf32>
    %73 = vector.shape_cast %72 : vector<1x1x1x16xf32> to vector<1x16xf32>
    %cst_63 = arith.constant dense<0.000000e+00> : vector<16x16xf32>
    %74 = tpu.matmul %5, %71, %cst_63 {dimension_numbers = #tpu.dot_dimension_numbers<[1], [0], [0], [1], [0, 0, 1, 1], [], []>} : vector<16x32xbf16>, vector<32x16xbf16>, vector<16x16xf32> -> vector<16x16xf32>
    %75 = vector.broadcast %73 : vector<1x16xf32> to vector<16x16xf32>
    %76 = arith.addf %74, %75 : vector<16x16xf32>
    %77 = arith.truncf %76 : vector<16x16xf32> to vector<16x16xbf16>
    %78 = vector.shape_cast %77 : vector<16x16xbf16> to vector<2x8x16xbf16>
    %c2_64 = arith.constant 2 : index
    %c1_65 = arith.constant 1 : index
    %c0_66 = arith.constant 0 : index
    %c0_67 = arith.constant 0 : index
    %79 = vector.load %arg5[%c2_64, %c1_65, %c0_66, %c0_67] : memref<3x2x32x16xbf16, #tpu.memory_space<vmem>>, vector<1x1x32x16xbf16>
    %80 = vector.shape_cast %79 : vector<1x1x32x16xbf16> to vector<32x16xbf16>
    %c2_68 = arith.constant 2 : index
    %c1_69 = arith.constant 1 : index
    %c0_70 = arith.constant 0 : index
    %c0_71 = arith.constant 0 : index
    %81 = vector.load %arg6[%c2_68, %c1_69, %c0_70, %c0_71] : memref<3x2x1x16xf32, #tpu.memory_space<vmem>>, vector<1x1x1x16xf32>
    %82 = vector.shape_cast %81 : vector<1x1x1x16xf32> to vector<1x16xf32>
    %cst_72 = arith.constant dense<0.000000e+00> : vector<16x16xf32>
    %83 = tpu.matmul %8, %80, %cst_72 {dimension_numbers = #tpu.dot_dimension_numbers<[1], [0], [0], [1], [0, 0, 1, 1], [], []>} : vector<16x32xbf16>, vector<32x16xbf16>, vector<16x16xf32> -> vector<16x16xf32>
    %84 = vector.broadcast %82 : vector<1x16xf32> to vector<16x16xf32>
    %85 = arith.addf %83, %84 : vector<16x16xf32>
    %86 = arith.truncf %85 : vector<16x16xf32> to vector<16x16xbf16>
    %87 = vector.shape_cast %86 : vector<16x16xbf16> to vector<2x8x16xbf16>
    "tpu.trace_start"() <{level = 10 : i32, message = "bld,bmd->blm"}> : () -> ()
    %cst_73 = arith.constant dense<0.000000e+00> : vector<2x8x8xf32>
    %88 = tpu.matmul %69, %78, %cst_73 {dimension_numbers = #tpu.dot_dimension_numbers<[2], [2], [1], [1], [0, 0, 0, 1, 1, 1], [0], [0]>} : vector<2x8x16xbf16>, vector<2x8x16xbf16>, vector<2x8x8xf32> -> vector<2x8x8xf32>
    %cst_74 = arith.constant -1.000000e+30 : f32
    "tpu.trace_stop"() : () -> ()
    %89 = vector.broadcast %cst_74 : f32 to vector<2x8x8xf32>
    %90 = arith.select %11, %89, %88 : vector<2x8x8xi1>, vector<2x8x8xf32>
    %cst_75 = arith.constant dense<0xFF800000> : vector<2x8xf32>
    %91 = vector.multi_reduction <maximumf>, %90, %cst_75 [2] : vector<2x8x8xf32> to vector<2x8xf32>
    %92 = vector.shape_cast %91 : vector<2x8xf32> to vector<2x8x1xf32>
    %93 = vector.broadcast %92 : vector<2x8x1xf32> to vector<2x8x8xf32>
    %94 = arith.subf %90, %93 : vector<2x8x8xf32>
    %95 = math.exp %94 : vector<2x8x8xf32>
    %cst_76 = arith.constant dense<0.000000e+00> : vector<2x8xf32>
    %96 = vector.multi_reduction <add>, %95, %cst_76 [2] : vector<2x8x8xf32> to vector<2x8xf32>
    %97 = vector.shape_cast %96 : vector<2x8xf32> to vector<2x8x1xf32>
    %98 = tpu.reciprocal %97 {approx = true} : vector<2x8x1xf32> -> vector<2x8x1xf32>
    %99 = vector.broadcast %98 : vector<2x8x1xf32> to vector<2x8x8xf32>
    %100 = arith.mulf %95, %99 : vector<2x8x8xf32>
    %101 = arith.truncf %100 : vector<2x8x8xf32> to vector<2x8x8xbf16>
    "tpu.trace_start"() <{level = 10 : i32, message = "blm,bmd->bld"}> : () -> ()
    %cst_77 = arith.constant dense<0.000000e+00> : vector<2x8x16xf32>
    %102 = tpu.matmul %101, %87, %cst_77 {dimension_numbers = #tpu.dot_dimension_numbers<[2], [1], [1], [2], [0, 0, 0, 1, 1, 2], [0], [0]>} : vector<2x8x8xbf16>, vector<2x8x16xbf16>, vector<2x8x16xf32> -> vector<2x8x16xf32>
    "tpu.trace_stop"() : () -> ()
    %103 = vector.shape_cast %102 : vector<2x8x16xf32> to vector<16x16xf32>
    %104 = arith.truncf %103 : vector<16x16xf32> to vector<16x16xbf16>
    %c1_78 = arith.constant 1 : index
    %c0_79 = arith.constant 0 : index
    %c0_80 = arith.constant 0 : index
    %105 = vector.load %arg7[%c1_78, %c0_79, %c0_80] : memref<2x16x128xbf16, #tpu.memory_space<vmem>>, vector<1x16x128xbf16>
    %106 = vector.shape_cast %105 : vector<1x16x128xbf16> to vector<16x128xbf16>
    %cst_81 = arith.constant dense<0.000000e+00> : vector<16x128xf32>
    %107 = tpu.matmul %104, %106, %cst_81 {dimension_numbers = #tpu.dot_dimension_numbers<[1], [0], [0], [1], [0, 0, 1, 1], [], []>} : vector<16x16xbf16>, vector<16x128xbf16>, vector<16x128xf32> -> vector<16x128xf32>
    %108 = arith.addf %60, %107 : vector<16x128xf32>
    %c0_82 = arith.constant 0 : index
    %c0_83 = arith.constant 0 : index
    %109 = vector.load %arg8[%c0_82, %c0_83] : memref<1x128xf32, #tpu.memory_space<vmem>>, vector<1x128xf32>
    %110 = vector.broadcast %109 : vector<1x128xf32> to vector<16x128xf32>
    %111 = arith.addf %108, %110 : vector<16x128xf32>
    %112 = vector.shape_cast %111 : vector<16x128xf32> to vector<2x8x128xf32>
    %c0_84 = arith.constant 0 : index
    %c0_85 = arith.constant 0 : index
    %c0_86 = arith.constant 0 : index
    %113 = vector.load %arg9[%c0_84, %c0_85, %c0_86] : memref<2x8x128xf32, #tpu.memory_space<vmem>>, vector<2x8x128xf32>
    tpu.vector_store %arg9[%c0_84, %c0_85, %c0_86], %112 {strides = array<i32>} : memref<2x8x128xf32, #tpu.memory_space<vmem>>, vector<2x8x128xf32>,
    return
  }
  func.func @transform_0(%arg0: i32) -> (i32, i32, i32) {
    %c0_i32 = arith.constant 0 : i32
    %c0_i32_0 = arith.constant 0 : i32
    %c0_i32_1 = arith.constant 0 : i32
    return %arg0, %c0_i32, %c0_i32_0 : i32, i32, i32
  }
  func.func @transform_1(%arg0: i32) -> (i32, i32, i32) {
    %c0_i32 = arith.constant 0 : i32
    %c0_i32_0 = arith.constant 0 : i32
    %c0_i32_1 = arith.constant 0 : i32
    return %arg0, %c0_i32, %c0_i32_0 : i32, i32, i32
  }
  func.func @transform_2(%arg0: i32) -> (i32, i32, i32) {
    %c0_i32 = arith.constant 0 : i32
    %c0_i32_0 = arith.constant 0 : i32
    %c0_i32_1 = arith.constant 0 : i32
    return %arg0, %c0_i32, %c0_i32_0 : i32, i32, i32
  }
  func.func @transform_3(%arg0: i32) -> (i32, i32, i32) {
    %c0_i32 = arith.constant 0 : i32
    %c0_i32_0 = arith.constant 0 : i32
    %c0_i32_1 = arith.constant 0 : i32
    return %arg0, %c0_i32, %c0_i32_0 : i32, i32, i32
  }
  func.func @transform_4(%arg0: i32) -> (i32, i32, i32, i32) {
    %c0_i32 = arith.constant 0 : i32
    %c0_i32_0 = arith.constant 0 : i32
    %c0_i32_1 = arith.constant 0 : i32
    %c0_i32_2 = arith.constant 0 : i32
    %c0_i32_3 = arith.constant 0 : i32
    return %c0_i32, %c0_i32_0, %c0_i32_1, %c0_i32_2 : i32, i32, i32, i32
  }
  func.func @transform_5(%arg0: i32) -> (i32, i32, i32, i32) {
    %c0_i32 = arith.constant 0 : i32
    %c0_i32_0 = arith.constant 0 : i32
    %c0_i32_1 = arith.constant 0 : i32
    %c0_i32_2 = arith.constant 0 : i32
    %c0_i32_3 = arith.constant 0 : i32
    return %c0_i32, %c0_i32_0, %c0_i32_1, %c0_i32_2 : i32, i32, i32, i32
  }
  func.func @transform_6(%arg0: i32) -> (i32, i32, i32) {
    %c0_i32 = arith.constant 0 : i32
    %c0_i32_0 = arith.constant 0 : i32
    %c0_i32_1 = arith.constant 0 : i32
    %c0_i32_2 = arith.constant 0 : i32
    return %c0_i32, %c0_i32_0, %c0_i32_1 : i32, i32, i32
  }
  func.func @transform_7(%arg0: i32) -> (i32, i32) {
    %c0_i32 = arith.constant 0 : i32
    %c0_i32_0 = arith.constant 0 : i32
    %c0_i32_1 = arith.constant 0 : i32
    return %c0_i32, %c0_i32_0 : i32, i32
  }
  func.func @transform_8(%arg0: i32) -> (i32, i32, i32) {
    %c0_i32 = arith.constant 0 : i32
    %c0_i32_0 = arith.constant 0 : i32
    %c0_i32_1 = arith.constant 0 : i32
    return %arg0, %c0_i32, %c0_i32_0 : i32, i32, i32
  }
}

</mosaic_0001>

<bundles_post_ra>
// kernel: tpu_custom_call.1
= control target key start
LH: loop header
LB: loop body
LE: loop exit
PB: predicated region body
PF: predicated region fallthrough
CT: control target
= control target key end

     0   :  { %v1334_v1 = vmov 0.0   ;;  %vm1335_vm0 = vmmov 0   ;;  %vm67_vm1 = vcmask 261120   ;;  %s1604_s0 = inlined_call_operand.vmem [shape: f32[2,8,32], index: 0, kind: input, shape index: {}]   ;;  %s1605_s1 = inlined_call_operand.vmem [shape: f32[2,8,32], index: 1, kind: input, shape index: {}]   ;;  %s1606_s2 = inlined_call_operand.vmem [shape: f32[2,8,32], index: 2, kind: input, shape index: {}]   ;;  %s1607_s3 = inlined_call_operand.vmem [shape: f32[2,8,8], index: 3, kind: input, shape index: {}]   ;;  %s1608_s4 = inlined_call_operand.vmem [shape: bf16[3,2,32,16], index: 4, kind: input, shape index: {}]   ;;  %s1609_s5 = inlined_call_operand.vmem [shape: f32[3,2,1,16], index: 5, kind: input, shape index: {}]   ;;  %s1610_s6 = inlined_call_operand.vmem [shape: bf16[2,16,128], index: 6, kind: input, shape index: {}]   ;;  %s1611_s7 = inlined_call_operand.vmem [shape: f32[1,128], index: 7, kind: input, shape index: {}]   ;;  %s1612_s8 = inlined_call_operand.hbm [shape: f32[2,8,128], index: 8, kind: output, shape index: {}]  }
   0x1   :  { %v1280_v0 = vld [vmem:[%s1608_s4 + $0x20] sm:$0xff]   ;;  %1175 = vmatprep.subr.bf16.mxu1 %v1334_v1  ;;  %1167 = vmatprep.subr.bf16.mxu0 %v1334_v1  ;;  %v1281_v2 = vld [vmem:[%s1608_s4 + $0x28] sm:$0xff]  }
   0x2   :  { %1176 = vmatpush3.bf16.msra.mxu1 %v1280_v0  ;;  %v1282_v3 = vld [vmem:[%s1608_s4] sm:$0xff]   ;;  %1179 = vmatprep.mubr.msk.bf16.mxu1 %vm1335_vm0, %v1334_v1  ;;  %v35_v5 = vld [vmem:[%s1604_s0 + $0x8] sm:$0xff] }
   0x3   :  { %1177 = vmatprep.subr.bf16.mxu1 %v1334_v1  ;;  %v34_v4 = vld [vmem:[%s1604_s0] sm:$0xff]  ;;  %1171 = vmatprep.mubr.msk.bf16.mxu0 %vm1335_vm0, %v1334_v1  ;;  %v1283_v6 = vld [vmem:[%s1608_s4 + $0x8] sm:$0xff]  }
   0x4   :  { %1168 = vmatpush3.bf16.msra.mxu0 %v1282_v3  ;;  %v31_v7 = vld [vmem:[%s1606_s2] sm:$0xff]  ;;  %v1412_v8 = vpack.c.bf16 %v35_v5, %v34_v4  ;;  %v32_v9 = vld [vmem:[%s1606_s2 + $0x8] sm:$0xff] }
   0x5   :  { %1169 = vmatprep.subr.bf16.mxu0 %v1334_v1  ;;  %v1418_v10 = vpack.c.bf16 %v32_v9, %v31_v7  ;;  %v1284_v11 = vld [vmem:[%s1608_s4 + $0x40] sm:$0xff]   ;;  %v1285_v12 = vld [vmem:[%s1608_s4 + $0x48] sm:$0xff]  }
   0x6   :  { %1178 = vmatpush3.bf16.msra.mxu1 %v1281_v2 }
   0x7   :  { %1191 = vmatprep.subr.bf16.mxu1 %v1334_v1 }
   0x8   :  { %1170 = vmatpush3.bf16.msra.mxu0 %v1283_v6 }
   0x9   :  { %1180 = vmatmul.mubr.msk.bf16.vlgmr.msra.gmra.mrb[0].mxu1 %vm67_vm1, %v1412_v8  ;;  %1183 = vmatprep.subr.bf16.mxu0 %v1334_v1 }
   0xa   :  { %1193 = vmatprep.mubr.msk.bf16.mxu1 %vm1335_vm0, %v1334_v1 }
   0xb   :  { %1172 = vmatmul.mubr.msk.bf16.vlgmr.msra.gmra.mrb[0].mxu0 %vm67_vm1, %v1418_v10 }
   0xc   :  { %1184 = vmatpush3.bf16.msra.mxu0 %v1284_v11  ;;  %1187 = vmatprep.mubr.msk.bf16.mxu0 %vm1335_vm0, %v1334_v1 }
   0xd   :  { %1185 = vmatprep.subr.bf16.mxu0 %v1334_v1 }
   0xe   :  { %13 = vsyncpa [#allocation3], 0  ;;  %v37_v13 = vld [vmem:[%s1605_s1] sm:$0xff]  ;;  %v38_v14 = vld [vmem:[%s1605_s1 + $0x8] sm:$0xff]  ;;  %vm268_vm2 = vcmask 130048   ;;  %vm391_vm3 = vcmask 1043456  }
   0xf   :  { %v1444_v15 = vpack.c.bf16 %v38_v14, %v37_v13  ;;  %v1052_v16 = vld [vmem:[%s1609_s5 + $0x2] ss:$0 sm:$0xff]  ;;  %v1041_v21 = vld [vmem:[%s1609_s5] ss:$0 sm:$0xff]  ;;  %v1063_v36 = vld [vmem:[%s1609_s5 + $0x4] ss:$0 sm:$0xff] }
  0x10   :  { %1186 = vmatpush3.bf16.msra.mxu0 %v1285_v12  ;;  %v1476_v47 = vld [vmem:[%s1607_s3 + $0x8] sm:$0xff]  ;;  %v1481_v48 = vld [vmem:[%s1607_s3] sm:$0xff]  ;;  %vm363_vm6 = vcmask 64512   ;;  %v1286_v14 = vld [vmem:[%s1608_s4 + $0x30] sm:$0xff]   ;;  %s1336_s9 = smov [#allocation2]  }
  0x11   :  { %1197 = vmatprep.subr.bf16.mxu0 %v1334_v1  ;;  %vm43_vm4 = vcmp.eq.f32.partialorder %v1476_v47, 0.0  ;;  %vm42_vm5 = vcmp.eq.f32.partialorder %v1481_v48, 0.0  ;;  %s1030_s10 = sshll.u32 %s1336_s9, 4  ;;  %s1031_s10 = int_to_ptr.vmem [resolvable:$true] %s1030_s10 }
  0x12   :  { %s1310_s11 = scalar_lea.vmem %s1031_s10, 256  ;;  %p1315_p1 = scmp.lt.s32.totalorder %s1031_s10, %s1031_s10 }
  0x13   :  { %1188 = vmatmul.mubr.msk.bf16.vlgmr.msra.gmra.mrb[4].mxu0 %vm67_vm1, %v1444_v15  ;;  %p1311_p0 = scmp.ne.s32.totalorder %s1031_s10, %s1310_s11  ;;  %p1316_p2 = scmp.lt.s32.totalorder %s1310_s11, %s1310_s11 }
  0x14   :  { %1199 = vmatprep.mubr.msk.bf16.mxu0 %vm1335_vm0, %v1334_v1 }
  0x15   :  { %p1317_p3 = por %p1316_p2, %p1315_p1 }
  0x17   :  { %p1318_p4 = pnand %p1317_p3, %p1311_p0 }
  0xdc   :  { %v180_v17 = vpop.f32.mrb[0].mxu1 }
  0xdd   :  { %v181_v18 = vadd.f32 %v1052_v16, %v180_v17  ;;  %v1181_v19 = vpop.f32.mrb[1].mxu1 }
  0xde   :  { %v183_v20 = vpop.f32.mrb[2].mxu1  ;;  %v105_v22 = vpop.f32.mrb[0].mxu0  ;;  %v1287_v19 = vld [vmem:[%s1608_s4 + $0x38] sm:$0xff]  }
  0xdf   :  { %v1119_v23 = vpack.c.bf16 %v181_v18, %v181_v18  ;;  %v184_v24 = vadd.f32 %v1052_v16, %v183_v20  ;;  %v1182_v25 = vpop.f32.mrb[3].mxu1  ;;  %v1173_v26 = vpop.f32.mrb[1].mxu0  ;;  %v106_v30 = vadd.f32 %v1041_v21, %v105_v22  ;;  %v1288_v20 = vld [vmem:[%s1608_s4 + $0x10] sm:$0xff]   ;;  %v1289_v22 = vld [vmem:[%s1608_s4 + $0x18] sm:$0xff]  }
  0xe0   :  { %v108_v27 = vpop.f32.mrb[2].mxu0 }
  0xe1   :  { %v273_v28 = vsel %vm268_vm2, %v1119_v23, 0  ;;  %v1120_v29 = vpack.c.bf16 %v184_v24, %v184_v24  ;;  %v1174_v31 = vpop.f32.mrb[3].mxu0  ;;  %v1117_v33 = vpack.c.bf16 %v106_v30, %v106_v30  ;;  %v109_v34 = vadd.f32 %v1041_v21, %v108_v27  ;;  %v1290_v23 = vld [vmem:[%s1608_s4 + $0x50] sm:$0xff]  }
  0xe2   :  { %1192 = vmatpush3.bf16.xpose.msra.mxu1 %v273_v28  ;;  %v1089_v31 = vld [vmem:[%s1609_s5 + $0x3] ss:$0 sm:$0xff] }
  0xe3   :  { %v319_v32 = vsel %vm268_vm2, %v1120_v29, 0  ;;  %1203 = vmatprep.subr.bf16.mxu1 %v1334_v1  ;;  %v1118_v35 = vpack.c.bf16 %v109_v34, %v109_v34 }
  0xe4   :  { %1198 = vmatpush3.bf16.xpose.msra.mxu0 %v319_v32 }
  0xe5   :  { %1209 = vmatprep.subr.bf16.mxu0 %v1334_v1 }
  0xe6   :  { %v255_v37 = vpop.f32.mrb[4].mxu0 }
  0xe7   :  { %v256_v38 = vadd.f32 %v1063_v36, %v255_v37  ;;  %v1189_v39 = vpop.f32.mrb[5].mxu0 }
  0xe8   :  { %v258_v40 = vpop.f32.mrb[6].mxu0 }
  0xe9   :  { %1194 = vmatmul.mubr.msk.bf16.vlgmr.msra.gmra.mrb[4].mxu1 %vm268_vm2, %v1117_v33  ;;  %v1121_v41 = vpack.c.bf16 %v256_v38, %v256_v38  ;;  %v259_v42 = vadd.f32 %v1063_v36, %v258_v40  ;;  %v1190_v43 = vpop.f32.mrb[7].mxu0  ;;  %v1078_v36 = vld [vmem:[%s1609_s5 + $0x1] ss:$0 sm:$0xff] }
  0xea   :  { %1205 = vmatprep.mubr.msk.bf16.mxu1 %vm1335_vm0, %v1334_v1 }
  0xeb   :  { %1200 = vmatmul.mubr.msk.bf16.vlgmr.msra.gmra.mrb[8].mxu0 %vm268_vm2, %v1118_v35  ;;  %v393_v44 = vsel %vm391_vm3, %v1121_v41, 0  ;;  %v1122_v45 = vpack.c.bf16 %v259_v42, %v259_v42 }
  0xec   :  { %1211 = vmatprep.mubr.msk.bf16.mxu0 %vm1335_vm0, %v1334_v1  ;;  %1204 = vmatpush3.bf16.msra.mxu1 %v393_v44 }
  0xed   :  { %v439_v46 = vsel %vm391_vm3, %v1122_v45, 0  ;;  %1215 = vmatprep.subr.bf16.mxu1 %v1334_v1 }
  0xee   :  { %1210 = vmatpush3.bf16.msra.mxu0 %v439_v46 }
  0xef   :  { %1223 = vmatprep.subr.bf16.mxu0 %v1334_v1 }
 0x1bc   :  { %v309_v49 = vpop.f32.mrb[4].mxu1 }
 0x1bd   :  { %v1195_v50 = vpop.f32.mrb[5].mxu1  ;;  %v361_v58 = vsel %vm42_vm5, -1e+30, %v309_v49 }
 0x1be   :  { %v312_v51 = vpop.f32.mrb[6].mxu1  ;;  %v355_v52 = vpop.f32.mrb[8].mxu0  ;;  %v364_v60 = vsel %vm363_vm6, %v361_v58, -inf }
 0x1bf   :  { %v362_v53 = vsel %vm43_vm4, -1e+30, %v355_v52  ;;  %v1196_v54 = vpop.f32.mrb[7].mxu1  ;;  %v1201_v55 = vpop.f32.mrb[9].mxu0 }
 0x1c0   :  { %v358_v56 = vpop.f32.mrb[10].mxu0  ;;  %v367_v57 = vsel %vm363_vm6, %v362_v53, -inf }
 0x1c1   :  { %368 = vmax.xlane.f32.xlu0 %v367_v57  ;;  %v1202_v59 = vpop.f32.mrb[11].mxu0 }
 0x1c5   :  { %365 = vmax.xlane.f32.xlu0 %v364_v60 }
 0x24e   :  { %v369_v61 = vpop.xlane.xlu0 %368 }
 0x24f   :  { %v371_v62 = vsub.f32 %v362_v53, %v369_v61  ;;  %v1100_v53 = vld [vmem:[%s1609_s5 + $0x5] ss:$0 sm:$0xff] }
 0x251   :  { %v374_v63 = vmul.f32 1.442695, %v371_v62 }
 0x252   :  { %v366_v0 = vpop.xlane.xlu0 %365 }
 0x253   :  { %1294 = vpow2.f32 %v374_v63  ;;  %v370_v2 = vsub.f32 %v361_v58, %v366_v0 }
 0x255   :  { %v372_v3 = vmul.f32 1.442695, %v370_v2 }
 0x257   :  { %1296 = vpow2.f32 %v372_v3 }
 0x25d   :  { %v1295_v4 = vpop.eup %1294 }
 0x25e   :  { %v379_v5 = vsel %vm363_vm6, %v1295_v4, 0.0 }
 0x25f   :  { %380 = vadd.xlane.f32.xlu1 %v379_v5 }
 0x261   :  { %v1297_v6 = vpop.eup %1296 }
 0x262   :  { %v376_v7 = vsel %vm363_vm6, %v1297_v6, 0.0 }
 0x263   :  { %377 = vadd.xlane.f32.xlu1 %v376_v7 }
 0x2ec   :  { %v381_v9 = vpop.xlane.xlu1 %380 }
 0x2ed   :  { %1298 = vrcp.f32 %v381_v9 }
 0x2f0   :  { %v378_v11 = vpop.xlane.xlu1 %377 }
 0x2f1   :  { %1300 = vrcp.f32 %v378_v11 }
 0x2f7   :  { %v1299_v12 = vpop.eup %1298 }
 0x2f8   :  { %v385_v13 = vmul.f32 %v1299_v12, %v1295_v4 }
 0x2fa   :  { %v387_v16 = vpack.c.bf16 %v385_v13, %v385_v13 }
 0x2fb   :  { %v1301_v17 = vpop.eup %1300 }
 0x2fc   :  { %v384_v18 = vmul.f32 %v1301_v17, %v1297_v6  ;;  %1212 = vmatmul.mubr.msk.bf16.vlgmr.msra.gmra.mrb[12].mxu0 %vm363_vm6, %v387_v16 }
 0x2fd   :  { %1224 = vmatpush3.bf16.msra.mxu0 %v1286_v14  ;;  %1227 = vmatprep.mubr.msk.bf16.mxu0 %vm1335_vm0, %v1334_v1 }
 0x2fe   :  { %v386_v21 = vpack.c.bf16 %v384_v18, %v384_v18  ;;  %1225 = vmatprep.subr.bf16.mxu0 %v1334_v1 }
 0x300   :  { %1206 = vmatmul.mubr.msk.bf16.vlgmr.msra.gmra.mrb[8].mxu1 %vm363_vm6, %v386_v21 }
 0x301   :  { %1226 = vmatpush3.bf16.msra.mxu0 %v1287_v19  ;;  %1216 = vmatpush3.bf16.msra.mxu1 %v1288_v20 }
 0x302   :  { %1217 = vmatprep.subr.bf16.mxu1 %v1334_v1  ;;  %1219 = vmatprep.mubr.msk.bf16.mxu1 %vm1335_vm0, %v1334_v1 }
 0x303   :  { %1239 = vmatprep.subr.bf16.mxu0 %v1334_v1 }
 0x304   :  { %1228 = vmatmul.mubr.msk.bf16.vlgmr.msra.gmra.mrb[16].mxu0 %vm67_vm1, %v1412_v8  ;;  %v1291_v8 = vld [vmem:[%s1608_s4 + $0x58] sm:$0xff]  }
 0x305   :  { %1218 = vmatpush3.bf16.msra.mxu1 %v1289_v22  ;;  %1241 = vmatprep.mubr.msk.bf16.mxu0 %vm1335_vm0, %v1334_v1 }
 0x306   :  { %1231 = vmatprep.subr.bf16.mxu1 %v1334_v1 }
 0x308   :  { %1220 = vmatmul.mubr.msk.bf16.vlgmr.msra.gmra.mrb[12].mxu1 %vm67_vm1, %v1418_v10 }
 0x309   :  { %1235 = vmatprep.mubr.msk.bf16.mxu1 %vm1335_vm0, %v1334_v1  ;;  %1232 = vmatpush3.bf16.msra.mxu1 %v1290_v23 }
 0x30a   :  { %1233 = vmatprep.subr.bf16.mxu1 %v1334_v1 }
 0x30d   :  { %1234 = vmatpush3.bf16.msra.mxu1 %v1291_v8 }
 0x30e   :  { %1245 = vmatprep.subr.bf16.mxu1 %v1334_v1 }
 0x310   :  { %1236 = vmatmul.mubr.msk.bf16.vlgmr.msra.gmra.mrb[16].mxu1 %vm67_vm1, %v1444_v15 }
 0x311   :  { %1247 = vmatprep.mubr.msk.bf16.mxu1 %vm1335_vm0, %v1334_v1 }
 0x3cf   :  { %v1535_v10 = vpop.f32.mrb[12].mxu0 }
 0x3d0   :  { %v1213_v24 = vpop.f32.mrb[13].mxu0 }
 0x3d1   :  { %v478_v25 = vpop.f32.mrb[14].mxu0 }
 0x3d2   :  { %v1214_v26 = vpop.f32.mrb[15].mxu0 }
 0x3d3   :  { %v1537_v27 = vpop.f32.mrb[8].mxu1 }
 0x3d4   :  { %v481_v28 = vpack.c.bf16 %v1535_v10, %v1537_v27  ;;  %v1207_v29 = vpop.f32.mrb[9].mxu1  ;;  %v1116_v10 = vld [vmem:[%s1611_s7] ss:$0 sm:$0xff] }
 0x3d5   :  { %v432_v30 = vpop.f32.mrb[10].mxu1 }
 0x3d6   :  { %v1208_v15 = vpop.f32.mrb[11].mxu1  ;;  %v1293_v30 = vld [vmem:[%s1610_s6 + $0x8] sm:$0xff]  }
 0x3d7   :  { %v615_v32 = vpop.f32.mrb[16].mxu0 }
 0x3d8   :  { %v616_v33 = vadd.f32 %v1089_v31, %v615_v32  ;;  %v1229_v34 = vpop.f32.mrb[17].mxu0  ;;  %v1292_v32 = vld [vmem:[%s1610_s6] sm:$0xff]  }
 0x3d9   :  { %v618_v35 = vpop.f32.mrb[18].mxu0 }
 0x3da   :  { %v1125_v37 = vpack.c.bf16 %v616_v33, %v616_v33  ;;  %v619_v38 = vadd.f32 %v1089_v31, %v618_v35  ;;  %v1230_v39 = vpop.f32.mrb[19].mxu0 }
 0x3db   :  { %v543_v40 = vpop.f32.mrb[12].mxu1 }
 0x3dc   :  { %v704_v41 = vsel %vm268_vm2, %v1125_v37, 0  ;;  %v1126_v42 = vpack.c.bf16 %v619_v38, %v619_v38  ;;  %v544_v43 = vadd.f32 %v1078_v36, %v543_v40  ;;  %v1221_v44 = vpop.f32.mrb[13].mxu1 }
 0x3dd   :  { %1240 = vmatpush3.bf16.xpose.msra.mxu0 %v704_v41  ;;  %v546_v45 = vpop.f32.mrb[14].mxu1 }
 0x3de   :  { %v750_v46 = vsel %vm268_vm2, %v1126_v42, 0  ;;  %v1222_v49 = vpop.f32.mrb[15].mxu1  ;;  %1251 = vmatprep.subr.bf16.mxu0 %v1334_v1  ;;  %v1123_v50 = vpack.c.bf16 %v544_v43, %v544_v43  ;;  %v547_v51 = vadd.f32 %v1078_v36, %v546_v45 }
 0x3df   :  { %1246 = vmatpush3.bf16.xpose.msra.mxu1 %v750_v46 }
 0x3e0   :  { %1257 = vmatprep.subr.bf16.mxu1 %v1334_v1  ;;  %v1124_v52 = vpack.c.bf16 %v547_v51, %v547_v51 }
 0x3e3   :  { %v687_v54 = vpop.f32.mrb[16].mxu1 }
 0x3e4   :  { %1242 = vmatmul.mubr.msk.bf16.vlgmr.msra.gmra.mrb[20].mxu0 %vm268_vm2, %v1123_v50  ;;  %v688_v55 = vadd.f32 %v1100_v53, %v687_v54  ;;  %v1237_v56 = vpop.f32.mrb[17].mxu1 }
 0x3e5   :  { %1253 = vmatprep.mubr.msk.bf16.mxu0 %vm1335_vm0, %v1334_v1  ;;  %v690_v57 = vpop.f32.mrb[18].mxu1 }
 0x3e6   :  { %1248 = vmatmul.mubr.msk.bf16.vlgmr.msra.gmra.mrb[20].mxu1 %vm268_vm2, %v1124_v52  ;;  %v1127_v58 = vpack.c.bf16 %v688_v55, %v688_v55  ;;  %v691_v59 = vadd.f32 %v1100_v53, %v690_v57  ;;  %v1238_v60 = vpop.f32.mrb[19].mxu1 }
 0x3e7   :  { %1259 = vmatprep.mubr.msk.bf16.mxu1 %vm1335_vm0, %v1334_v1 }
 0x3e8   :  { %v822_v61 = vsel %vm391_vm3, %v1127_v58, 0  ;;  %v1128_v62 = vpack.c.bf16 %v691_v59, %v691_v59 }
 0x3e9   :  { %1252 = vmatpush3.bf16.msra.mxu0 %v822_v61 }
 0x3ea   :  { %v868_v63 = vsel %vm391_vm3, %v1128_v62, 0  ;;  %1263 = vmatprep.subr.bf16.mxu0 %v1334_v1 }
 0x3eb   :  { %1258 = vmatpush3.bf16.msra.mxu1 %v868_v63 }
 0x3ec   :  { %1269 = vmatprep.subr.bf16.mxu1 %v1334_v1 }
 0x4b7   :  { %v740_v0 = vpop.f32.mrb[20].mxu0 }
 0x4b8   :  { %v792_v2 = vsel %vm42_vm5, -1e+30, %v740_v0  ;;  %v1243_v3 = vpop.f32.mrb[21].mxu0 }
 0x4b9   :  { %v743_v4 = vpop.f32.mrb[22].mxu0  ;;  %v786_v5 = vpop.f32.mrb[20].mxu1  ;;  %v794_v6 = vsel %vm363_vm6, %v792_v2, -inf }
 0x4ba   :  { %v793_v7 = vsel %vm43_vm4, -1e+30, %v786_v5  ;;  %v1249_v9 = vpop.f32.mrb[21].mxu1  ;;  %795 = vmax.xlane.f32.xlu0 %v794_v6  ;;  %v1244_v11 = vpop.f32.mrb[23].mxu0 }
 0x4bb   :  { %v789_v12 = vpop.f32.mrb[22].mxu1  ;;  %v797_v13 = vsel %vm363_vm6, %v793_v7, -inf }
 0x4bc   :  { %798 = vmax.xlane.f32.xlu1 %v797_v13  ;;  %v1250_v14 = vpop.f32.mrb[23].mxu1 }
 0x547   :  { %v796_v16 = vpop.xlane.xlu0 %795 }
 0x548   :  { %v800_v17 = vsub.f32 %v792_v2, %v796_v16 }
 0x549   :  { %v799_v48 = vpop.xlane.xlu1 %798 }
 0x54a   :  { %v802_v18 = vmul.f32 1.442695, %v800_v17  ;;  %v801_v19 = vsub.f32 %v793_v7, %v799_v48 }
 0x54c   :  { %1302 = vpow2.f32 %v802_v18  ;;  %v804_v20 = vmul.f32 1.442695, %v801_v19 }
 0x54e   :  { %1304 = vpow2.f32 %v804_v20 }
 0x556   :  { %v1303_v21 = vpop.eup %1302 }
 0x557   :  { %v806_v47 = vsel %vm363_vm6, %v1303_v21, 0.0 }
 0x558   :  { %v1305_v22 = vpop.eup %1304  ;;  %807 = vadd.xlane.f32.xlu0 %v806_v47 }
 0x559   :  { %v809_v23 = vsel %vm363_vm6, %v1305_v22, 0.0 }
 0x55a   :  { %810 = vadd.xlane.f32.xlu1 %v809_v23 }
 0x5e5   :  { %v808_v8 = vpop.xlane.xlu0 %807 }
 0x5e6   :  { %1306 = vrcp.f32 %v808_v8 }
 0x5e7   :  { %v811_v24 = vpop.xlane.xlu1 %810 }
 0x5e8   :  { %1308 = vrcp.f32 %v811_v24 }
 0x5f0   :  { %v1307_v25 = vpop.eup %1306 }
 0x5f1   :  { %v814_v26 = vmul.f32 %v1307_v25, %v1303_v21 }
 0x5f2   :  { %v1309_v29 = vpop.eup %1308 }
 0x5f3   :  { %v816_v31 = vpack.c.bf16 %v814_v26, %v814_v26  ;;  %v815_v15 = vmul.f32 %v1309_v29, %v1305_v22 }
 0x5f5   :  { %v817_v33 = vpack.c.bf16 %v815_v15, %v815_v15  ;;  %1254 = vmatmul.mubr.msk.bf16.vlgmr.msra.gmra.mrb[24].mxu0 %vm363_vm6, %v816_v31 }
 0x5f6   :  { %1264 = vmatpush3.bf16.msra.mxu0 %v1293_v30  ;;  %1265 = vmatprep.mubr.msk.bf16.mxu0 %vm1335_vm0, %v1334_v1 }
 0x5f7   :  { %1260 = vmatmul.mubr.msk.bf16.vlgmr.msra.gmra.mrb[24].mxu1 %vm363_vm6, %v817_v33 }
 0x5f8   :  { %1270 = vmatpush3.bf16.msra.mxu1 %v1292_v32  ;;  %1271 = vmatprep.mubr.msk.bf16.mxu1 %vm1335_vm0, %v1334_v1 }
 0x5ff   :  { %1272 = vmatmul.mubr.msk.bf16.vlgmr.msra.gmra.mrb[28].mxu1 %vm268_vm2, %v481_v28 }
 0x6c8   :  { %v858_v34 = vpop.f32.mrb[24].mxu0 }
 0x6c9   :  { %v1255_v35 = vpop.f32.mrb[25].mxu0 }
 0x6ca   :  { %v861_v36 = vpop.f32.mrb[26].mxu0  ;;  %v904_v37 = vpop.f32.mrb[24].mxu1 }
 0x6cb   :  { %v910_v38 = vpack.c.bf16 %v904_v37, %v858_v34  ;;  %v1256_v39 = vpop.f32.mrb[27].mxu0  ;;  %v1261_v40 = vpop.f32.mrb[25].mxu1 }
 0x6cc   :  { %v907_v41 = vpop.f32.mrb[26].mxu1 }
 0x6cd   :  { %v1262_v42 = vpop.f32.mrb[27].mxu1  ;;  %1266 = vmatmul.mubr.msk.bf16.vlgmr.msra.gmra.mrb[28].mxu0 %vm268_vm2, %v910_v38 }
 0x6d2   :  { %v1007_v43 = vpop.f32.mrb[28].mxu1 }
 0x6d3   :  { %v1273_v44 = vpop.f32.mrb[29].mxu1 }
 0x6d4   :  { %v1010_v45 = vpop.f32.mrb[30].mxu1 }
 0x6d5   :  { %v1274_v1 = vpop.f32.mrb[31].mxu1 }
 0x7a0   :  { %v957_v46 = vpop.f32.mrb[28].mxu0 }
 0x7a1   :  { %v1008_v27 = vadd.f32 %v1007_v43, %v957_v46  ;;  %v1267_v28 = vpop.f32.mrb[29].mxu0 }
 0x7a2   :  { %v960_v49 = vpop.f32.mrb[30].mxu0 }
 0x7a3   :  { %v1021_v50 = vadd.f32 %v1116_v10, %v1008_v27  ;;  %v1011_v51 = vadd.f32 %v1010_v45, %v960_v49  ;;  %v1268_v52 = vpop.f32.mrb[31].mxu0 }
 0x7a5   :  { %1023 = vst [vmem:[#allocation2] sm:$0xff] %v1021_v50  ;;  %v1022_v53 = vadd.f32 %v1116_v10, %v1011_v51 }
 0x7a7   :  { %1024 = vst [vmem:[#allocation2 + $0x8] sm:$0xff] %v1022_v53 }
 0x7a8   :  { %1321 = shalt.err (!%p1318_p4)
}
 0x7a9   :  { %s1322_s13 = scalar_lea.hbm %s1612_s8, 256 }
 0x7aa   :  { %p1323_p5 = scmp.ne.s32.totalorder %s1612_s8, %s1322_s13  ;;  %p1326_p6 = scmp.lt.u32.totalorder %s1322_s13, %s1612_s8 }
 0x7ac   :  { %p1328_p7 = pnand %p1326_p6, %p1323_p5 }
 0x7ae   :  { %1331 = shalt.err (!%p1328_p7)
}
 0x7af   :  { %s1337_s17 = smov 128   ;;  %s1338_s18 = smov 8  }
 0x7b0   :  { %1036 = dma.vmem_to_hbm [thread:$0]  %s1031_s10, 256, %s1612_s8, [#allocation3], %s1337_s17, %s1337_s17, %s1338_s18  }
 0x7b1   :  { %1332 = dma.done.wait [#allocation3], 256  }
 0x7b2   :  { %1333 = vsyncadd [#allocation3], 4294967040 }
 0x7b3   :  { %1040 = vsyncpa [#allocation3], 1 }

</bundles_post_ra>
